<compile_context>
chip_gen: v6e
topology: v6e:2x2x1
jax: 0.10.0
libtpu: 0.0.40
codegen_flags: <defaults>
</compile_context>

<pallas_src>
import numpy as np
import jax
import jax.numpy as jnp
from jax.experimental import pallas as pl
from jax.experimental.pallas import tpu as pltpu


def _round_up(x, m):
    return (x + m - 1) // m * m


# ----------------------------- fused kernel --------------------------------


def fused_kernel(x_ref, w_big_ref, b_stem_ref, w_cat_ref, b_cat_ref,
                 w2_ref, b2_ref, mbag_ref,
                 feat_ref, proj_ref, ins_ref, bagp_ref):
    # --- encoder: AdaptiveAvgPool2d((1,1)) + Flatten + 1x1 linear stem ------
    # Folded into a single bf16 MXU matmul over the (row_block, H*W*C) block;
    # W_big already carries the 1/(H*W) pooling factor.
    feat = jnp.dot(x_ref[...], w_big_ref[...],
                   preferred_element_type=jnp.float32) + b_stem_ref[...]
    feat_bf = feat.astype(jnp.bfloat16)
    feat_ref[...] = feat_bf

    # --- fused [MIL head | projector layer-1] matmul -------------------------
    # w_cat = [w_fc padded to 128 lanes | w1]; slice at the 128-lane boundary.
    cat = jnp.dot(feat_bf, w_cat_ref[...],
                  preferred_element_type=jnp.float32) + b_cat_ref[...]
    nc_pad = bagp_ref.shape[-1]
    logits = cat[:, :nc_pad]                       # (row_block, 128) f32
    h = jnp.maximum(cat[:, nc_pad:], 0.0)          # (row_block, HID) f32

    # instance probabilities (stand-in MIL head: sigmoid of instance logits)
    ins_ref[...] = jax.nn.sigmoid(logits)

    # per-block bag partial sums (mean weights in mbag); cross-block sum and
    # sigmoid happen outside the kernel so the grid axis stays parallel.
    bagp_ref[0] = jnp.dot(mbag_ref[...], logits.astype(jnp.bfloat16),
                          preferred_element_type=jnp.float32)

    # --- projector: Linear(nf,512) -> ReLU -> Linear(512,feat_dim) -> L2 ----
    z = jnp.dot(h.astype(jnp.bfloat16), w2_ref[...],
                preferred_element_type=jnp.float32) + b2_ref[...]
    ss = jnp.sum(z * z, axis=-1, keepdims=True)
    proj_ref[...] = (z * jax.lax.rsqrt(ss + 1e-24)).astype(proj_ref.dtype)


# ----------------------------- wrapper --------------------------------------


def _full_spec(shape):
    ndim = len(shape)

    def imap(i):
        return (0,) * ndim

    return pl.BlockSpec(shape, imap)


def embedding_fused_call(x2d, mbag, w_big, b_stem, w_cat, b_cat, w2, b2,
                         nc_pad, *, row_block=None):
    """x2d: (N, H*W*C) lane-dense; mbag: (num_bags, N) per-bag mean weights."""
    n, hwc = x2d.shape
    nb = mbag.shape[0]
    nf = w_big.shape[1]
    hid = w2.shape[0]
    fd = w2.shape[1]

    if row_block is None:
        # Dense (N, H*W*C) bf16 layout: 1024-row blocks are ~2 MiB each,
        # comfortably double-buffered under the 48 MiB scoped VMEM limit
        # (leaves headroom on v7x's 64 MiB per-TC VMEM).
        row_block = min(1024, _round_up(n, 8))
    n_pad = _round_up(n, row_block)
    if n_pad != n:
        x2d = jnp.pad(x2d, ((0, n_pad - n), (0, 0)))
        mbag = jnp.pad(mbag, ((0, 0), (0, n_pad - n)))  # padded rows weigh 0

    num_blocks = n_pad // row_block
    grid = (num_blocks,)

    in_specs = [
        pl.BlockSpec((row_block, hwc), lambda i: (i, 0)),        # x
        _full_spec((hwc, nf)),                                   # w_big
        _full_spec((1, nf)),                                     # b_stem
        _full_spec((nf, nc_pad + hid)),                          # [w_fc|w1]
        _full_spec((1, nc_pad + hid)),                           # [b_fc|b1]
        _full_spec((hid, fd)),                                   # w2
        _full_spec((1, fd)),                                     # b2
        pl.BlockSpec((nb, row_block), lambda i: (0, i)),         # mbag
    ]
    out_specs = (
        pl.BlockSpec((row_block, nf), lambda i: (i, 0)),         # encoder feat
        pl.BlockSpec((row_block, fd), lambda i: (i, 0)),         # proj + L2
        pl.BlockSpec((row_block, nc_pad), lambda i: (i, 0)),     # instance probs
        pl.BlockSpec((1, nb, nc_pad), lambda i: (i, 0, 0)),      # bag partials
    )
    out_shape = (
        jax.ShapeDtypeStruct((n_pad, nf), jnp.bfloat16),
        jax.ShapeDtypeStruct((n_pad, fd), jnp.bfloat16),
        jax.ShapeDtypeStruct((n_pad, nc_pad), jnp.float32),
        jax.ShapeDtypeStruct((num_blocks, nb, nc_pad), jnp.float32),
    )

    feat, proj, ins, bagp = pl.pallas_call(
        fused_kernel,
        grid=grid,
        in_specs=in_specs,
        out_specs=out_specs,
        out_shape=out_shape,
        compiler_params=pltpu.CompilerParams(
            # no cross-iteration state -> row blocks shard across TCs on v7x
            dimension_semantics=("parallel",),
            vmem_limit_bytes=48 * 1024 * 1024,
        ),
    )(
        x2d.astype(jnp.bfloat16),
        w_big, b_stem, w_cat, b_cat, w2, b2,
        mbag.astype(jnp.bfloat16),
    )

    # tiny cross-block reduction + bag sigmoid in plain JAX
    bag = jax.nn.sigmoid(jnp.sum(bagp, axis=0))          # (nb, nc_pad)
    return feat[:n], proj[:n], ins[:n], bag


def embedding_model_forward(bags, params, projector=False, pred_on=False):
    """Mirrors Embeddingmodel.forward: returns (logits, yhat_instances, None, feat)."""
    num_bags = len(bags)
    all_images = jnp.concatenate(bags, axis=0)           # (N, H, W, C) NHWC
    n, h, w, c = all_images.shape
    # free reshape (contiguous NHWC) -> lane-dense 2-D activation
    x2d = all_images.reshape(n, h * w * c)

    nf = params["w_stem"].shape[1]
    hid = params["w1"].shape[1]
    nc = params["w_fc"].shape[1]
    nc_pad = _round_up(nc, 128)

    # fold AdaptiveAvgPool + 1x1 stem:  W_big[p*C + c, f] = w_stem[c, f] / (H*W)
    w_big = (jnp.tile(params["w_stem"], (h * w, 1)) / float(h * w)).astype(jnp.bfloat16)
    b_stem = params["b_stem"].astype(jnp.float32)

    # fused [MIL head | projector layer-1] weights (head padded to 128 lanes)
    w_fc_pad = jnp.zeros((nf, nc_pad), jnp.float32).at[:, :nc].set(params["w_fc"])
    b_fc_pad = jnp.zeros((1, nc_pad), jnp.float32).at[:, :nc].set(params["b_fc"])
    w_cat = jnp.concatenate([w_fc_pad, params["w1"]], axis=1).astype(jnp.bfloat16)
    b_cat = jnp.concatenate([b_fc_pad, params["b1"]], axis=1).astype(jnp.float32)

    w2 = params["w2"].astype(jnp.bfloat16)
    b2 = params["b2"].astype(jnp.float32)

    # per-bag mean-membership matrix (ragged bags supported)
    split_sizes = [int(b.shape[0]) for b in bags]
    offsets = np.cumsum([0] + split_sizes)
    mbag_np = np.zeros((num_bags, n), dtype=np.float32)
    for i, sz in enumerate(split_sizes):
        mbag_np[i, offsets[i]:offsets[i] + sz] = 1.0 / sz
    mbag = jnp.asarray(mbag_np)

    feat_raw, feat_proj, ins, bag = embedding_fused_call(
        x2d, mbag, w_big, b_stem, w_cat, b_cat, w2, b2, nc_pad)

    if pred_on:
        logits = bag[:, :nc]                              # (num_bags, num_classes)
        yhat_instances = [
            ins[offsets[i]:offsets[i] + split_sizes[i], :nc]
            for i in range(num_bags)
        ]
    else:
        logits = None
        yhat_instances = None

    feat = feat_proj if projector else feat_raw
    return logits, yhat_instances, None, feat


# ----------------------------- main ------------------------------------------

if __name__ == "__main__":
    NUM_BAGS, BAG_SIZE = 2, 4
    C, H, W = 4, 16, 16
    NF = 128          # self.nf (kept small; module uses 512)
    HID = 512         # projector hidden width
    FEAT_DIM = 128    # feat_dim
    NUM_CLASSES = 1

    key = jax.random.PRNGKey(0)
    ks = jax.random.split(key, 8)

    bags = [
        jax.random.normal(ks[i], (BAG_SIZE, H, W, C), dtype=jnp.float32)
        for i in range(NUM_BAGS)
    ]

    params = {
        "w_stem": jax.random.normal(ks[2], (C, NF), dtype=jnp.float32) * 0.1,
        "b_stem": jnp.zeros((1, NF), dtype=jnp.float32),
        "w_fc": jax.random.normal(ks[3], (NF, NUM_CLASSES), dtype=jnp.float32) * 0.1,
        "b_fc": jnp.zeros((1, NUM_CLASSES), dtype=jnp.float32),
        "w1": jax.random.normal(ks[4], (NF, HID), dtype=jnp.float32) * (NF ** -0.5),
        "b1": jnp.zeros((1, HID), dtype=jnp.float32),
        "w2": jax.random.normal(ks[5], (HID, FEAT_DIM), dtype=jnp.float32) * (HID ** -0.5),
        "b2": jnp.zeros((1, FEAT_DIM), dtype=jnp.float32),
    }

    logits, yhat_instances, _, feat = embedding_model_forward(
        bags, params, projector=True, pred_on=True
    )

    jax.block_until_ready(logits)
    for y in yhat_instances:
        jax.block_until_ready(y)
    jax.block_until_ready(feat)

    assert logits.shape == (NUM_BAGS, NUM_CLASSES)
    assert feat.shape == (NUM_BAGS * BAG_SIZE, FEAT_DIM)
    assert all(y.shape == (BAG_SIZE, NUM_CLASSES) for y in yhat_instances)

    print("KERNEL_OK")
</pallas_src>

<mosaic_0001>
module attributes {stable_mosaic.version = 11 : i64} {
  func.func @fused_kernel(%arg0: i32, %arg1: memref<8x1024xbf16, #tpu.memory_space<vmem>>, %arg2: memref<1024x128xbf16, #tpu.memory_space<vmem>>, %arg3: memref<1x128xf32, #tpu.memory_space<vmem>>, %arg4: memref<128x640xbf16, #tpu.memory_space<vmem>>, %arg5: memref<1x640xf32, #tpu.memory_space<vmem>>, %arg6: memref<512x128xbf16, #tpu.memory_space<vmem>>, %arg7: memref<1x128xf32, #tpu.memory_space<vmem>>, %arg8: memref<2x8xbf16, #tpu.memory_space<vmem>>, %arg9: memref<8x128xbf16, #tpu.memory_space<vmem>>, %arg10: memref<8x128xbf16, #tpu.memory_space<vmem>>, %arg11: memref<8x128xf32, #tpu.memory_space<vmem>>, %arg12: memref<1x2x128xf32, #tpu.memory_space<vmem>>) attributes {dimension_semantics = [#tpu.dimension_semantics<parallel>], iteration_bounds = array<i64: 1>, scalar_prefetch = 0 : i64, scratch_operands = 0 : i64, tpu.core_type = #tpu.core_type<tc>, window_params = [{transform_indices = @transform_0, window_bounds = array<i64: 8, 1024>}, {pipeline_mode = #tpu.pipeline_mode<synchronous>, transform_indices = @transform_1, window_bounds = array<i64: 1024, 128>}, {pipeline_mode = #tpu.pipeline_mode<synchronous>, transform_indices = @transform_2, window_bounds = array<i64: 1, 128>}, {pipeline_mode = #tpu.pipeline_mode<synchronous>, transform_indices = @transform_3, window_bounds = array<i64: 128, 640>}, {pipeline_mode = #tpu.pipeline_mode<synchronous>, transform_indices = @transform_4, window_bounds = array<i64: 1, 640>}, {pipeline_mode = #tpu.pipeline_mode<synchronous>, transform_indices = @transform_5, window_bounds = array<i64: 512, 128>}, {pipeline_mode = #tpu.pipeline_mode<synchronous>, transform_indices = @transform_6, window_bounds = array<i64: 1, 128>}, {transform_indices = @transform_7, window_bounds = array<i64: 2, 8>}, {transform_indices = @transform_8, window_bounds = array<i64: 8, 128>}, {transform_indices = @transform_9, window_bounds = array<i64: 8, 128>}, {transform_indices = @transform_10, window_bounds = array<i64: 8, 128>}, {transform_indices = @transform_11, window_bounds = array<i64: 1, 2, 128>}]} {
    %c0 = arith.constant 0 : index
    %c0_0 = arith.constant 0 : index
    %0 = vector.load %arg1[%c0, %c0_0] : memref<8x1024xbf16, #tpu.memory_space<vmem>>, vector<8x1024xbf16>
    %c0_1 = arith.constant 0 : index
    %c0_2 = arith.constant 0 : index
    %1 = vector.load %arg2[%c0_1, %c0_2] : memref<1024x128xbf16, #tpu.memory_space<vmem>>, vector<1024x128xbf16>
    %cst = arith.constant dense<0.000000e+00> : vector<8x128xf32>
    %2 = tpu.matmul %0, %1, %cst {dimension_numbers = #tpu.dot_dimension_numbers<[1], [0], [0], [1], [0, 0, 1, 1], [], []>} : vector<8x1024xbf16>, vector<1024x128xbf16>, vector<8x128xf32> -> vector<8x128xf32>
    %c0_3 = arith.constant 0 : index
    %c0_4 = arith.constant 0 : index
    %3 = vector.load %arg3[%c0_3, %c0_4] : memref<1x128xf32, #tpu.memory_space<vmem>>, vector<1x128xf32>
    %4 = vector.broadcast %3 : vector<1x128xf32> to vector<8x128xf32>
    %5 = arith.addf %2, %4 : vector<8x128xf32>
    %6 = arith.truncf %5 : vector<8x128xf32> to vector<8x128xbf16>
    %c0_5 = arith.constant 0 : index
    %c0_6 = arith.constant 0 : index
    %7 = vector.load %arg9[%c0_5, %c0_6] : memref<8x128xbf16, #tpu.memory_space<vmem>>, vector<8x128xbf16>
    tpu.vector_store %arg9[%c0_5, %c0_6], %6 {strides = array<i32>} : memref<8x128xbf16, #tpu.memory_space<vmem>>, vector<8x128xbf16>,
    %c0_7 = arith.constant 0 : index
    %c0_8 = arith.constant 0 : index
    %8 = vector.load %arg4[%c0_7, %c0_8] : memref<128x640xbf16, #tpu.memory_space<vmem>>, vector<128x640xbf16>
    %cst_9 = arith.constant dense<0.000000e+00> : vector<8x640xf32>
    %9 = tpu.matmul %6, %8, %cst_9 {dimension_numbers = #tpu.dot_dimension_numbers<[1], [0], [0], [1], [0, 0, 1, 1], [], []>} : vector<8x128xbf16>, vector<128x640xbf16>, vector<8x640xf32> -> vector<8x640xf32>
    %c0_10 = arith.constant 0 : index
    %c0_11 = arith.constant 0 : index
    %10 = vector.load %arg5[%c0_10, %c0_11] : memref<1x640xf32, #tpu.memory_space<vmem>>, vector<1x640xf32>
    %11 = vector.broadcast %10 : vector<1x640xf32> to vector<8x640xf32>
    %12 = arith.addf %9, %11 : vector<8x640xf32>
    %13 = vector.extract_strided_slice %12 {offsets = [0, 0], sizes = [8, 128], strides = [1, 1]} : vector<8x640xf32> to vector<8x128xf32>
    %14 = vector.extract_strided_slice %12 {offsets = [0, 128], sizes = [8, 512], strides = [1, 1]} : vector<8x640xf32> to vector<8x512xf32>
    %cst_12 = arith.constant 0.000000e+00 : f32
    %15 = vector.broadcast %cst_12 : f32 to vector<8x512xf32>
    %16 = arith.maximumf %14, %15 : vector<8x512xf32>
    %17 = arith.negf %13 : vector<8x128xf32>
    %18 = math.exp %17 : vector<8x128xf32>
    %cst_13 = arith.constant 1.000000e+00 : f32
    %19 = vector.broadcast %cst_13 : f32 to vector<8x128xf32>
    %20 = arith.addf %19, %18 : vector<8x128xf32>
    %21 = arith.divf %19, %20 : vector<8x128xf32>
    %c0_14 = arith.constant 0 : index
    %c0_15 = arith.constant 0 : index
    %22 = vector.load %arg11[%c0_14, %c0_15] : memref<8x128xf32, #tpu.memory_space<vmem>>, vector<8x128xf32>
    tpu.vector_store %arg11[%c0_14, %c0_15], %21 {strides = array<i32>} : memref<8x128xf32, #tpu.memory_space<vmem>>, vector<8x128xf32>,
    %c0_16 = arith.constant 0 : index
    %c0_17 = arith.constant 0 : index
    %23 = vector.load %arg8[%c0_16, %c0_17] : memref<2x8xbf16, #tpu.memory_space<vmem>>, vector<2x8xbf16>
    %24 = arith.truncf %13 : vector<8x128xf32> to vector<8x128xbf16>
    %cst_18 = arith.constant dense<0.000000e+00> : vector<2x128xf32>
    %25 = tpu.matmul %23, %24, %cst_18 {dimension_numbers = #tpu.dot_dimension_numbers<[1], [0], [0], [1], [0, 0, 1, 1], [], []>} : vector<2x8xbf16>, vector<8x128xbf16>, vector<2x128xf32> -> vector<2x128xf32>
    %c0_19 = arith.constant 0 : index
    %c0_20 = arith.constant 0 : index
    %c0_21 = arith.constant 0 : index
    %26 = vector.load %arg12[%c0_19, %c0_20, %c0_21] : memref<1x2x128xf32, #tpu.memory_space<vmem>>, vector<1x2x128xf32>
    %27 = vector.shape_cast %26 : vector<1x2x128xf32> to vector<2x128xf32>
    %28 = vector.shape_cast %25 : vector<2x128xf32> to vector<1x2x128xf32>
    tpu.vector_store %arg12[%c0_19, %c0_20, %c0_21], %28 {strides = array<i32>} : memref<1x2x128xf32, #tpu.memory_space<vmem>>, vector<1x2x128xf32>,
    %29 = arith.truncf %16 : vector<8x512xf32> to vector<8x512xbf16>
    %c0_22 = arith.constant 0 : index
    %c0_23 = arith.constant 0 : index
    %30 = vector.load %arg6[%c0_22, %c0_23] : memref<512x128xbf16, #tpu.memory_space<vmem>>, vector<512x128xbf16>
    %cst_24 = arith.constant dense<0.000000e+00> : vector<8x128xf32>
    %31 = tpu.matmul %29, %30, %cst_24 {dimension_numbers = #tpu.dot_dimension_numbers<[1], [0], [0], [1], [0, 0, 1, 1], [], []>} : vector<8x512xbf16>, vector<512x128xbf16>, vector<8x128xf32> -> vector<8x128xf32>
    %c0_25 = arith.constant 0 : index
    %c0_26 = arith.constant 0 : index
    %32 = vector.load %arg7[%c0_25, %c0_26] : memref<1x128xf32, #tpu.memory_space<vmem>>, vector<1x128xf32>
    %33 = vector.broadcast %32 : vector<1x128xf32> to vector<8x128xf32>
    %34 = arith.addf %31, %33 : vector<8x128xf32>
    %35 = arith.mulf %34, %34 : vector<8x128xf32>
    %cst_27 = arith.constant dense<0.000000e+00> : vector<8xf32>
    %36 = vector.multi_reduction <add>, %35, %cst_27 [1] : vector<8x128xf32> to vector<8xf32>
    %37 = vector.shape_cast %36 : vector<8xf32> to vector<8x1xf32>
    %cst_28 = arith.constant 1.000000e-24 : f32
    %38 = vector.broadcast %cst_28 : f32 to vector<8x1xf32>
    %39 = arith.addf %37, %38 : vector<8x1xf32>
    %40 = math.rsqrt %39 : vector<8x1xf32>
    %41 = vector.broadcast %40 : vector<8x1xf32> to vector<8x128xf32>
    %42 = arith.mulf %34, %41 : vector<8x128xf32>
    %43 = arith.truncf %42 : vector<8x128xf32> to vector<8x128xbf16>
    %c0_29 = arith.constant 0 : index
    %c0_30 = arith.constant 0 : index
    %44 = vector.load %arg10[%c0_29, %c0_30] : memref<8x128xbf16, #tpu.memory_space<vmem>>, vector<8x128xbf16>
    tpu.vector_store %arg10[%c0_29, %c0_30], %43 {strides = array<i32>} : memref<8x128xbf16, #tpu.memory_space<vmem>>, vector<8x128xbf16>,
    return
  }
  func.func @transform_0(%arg0: i32) -> (i32, i32) {
    %c0_i32 = arith.constant 0 : i32
    %c0_i32_0 = arith.constant 0 : i32
    return %arg0, %c0_i32 : i32, i32
  }
  func.func @transform_1(%arg0: i32) -> (i32, i32) {
    %c0_i32 = arith.constant 0 : i32
    %c0_i32_0 = arith.constant 0 : i32
    %c0_i32_1 = arith.constant 0 : i32
    return %c0_i32, %c0_i32_0 : i32, i32
  }
  func.func @transform_2(%arg0: i32) -> (i32, i32) {
    %c0_i32 = arith.constant 0 : i32
    %c0_i32_0 = arith.constant 0 : i32
    %c0_i32_1 = arith.constant 0 : i32
    return %c0_i32, %c0_i32_0 : i32, i32
  }
  func.func @transform_3(%arg0: i32) -> (i32, i32) {
    %c0_i32 = arith.constant 0 : i32
    %c0_i32_0 = arith.constant 0 : i32
    %c0_i32_1 = arith.constant 0 : i32
    return %c0_i32, %c0_i32_0 : i32, i32
  }
  func.func @transform_4(%arg0: i32) -> (i32, i32) {
    %c0_i32 = arith.constant 0 : i32
    %c0_i32_0 = arith.constant 0 : i32
    %c0_i32_1 = arith.constant 0 : i32
    return %c0_i32, %c0_i32_0 : i32, i32
  }
  func.func @transform_5(%arg0: i32) -> (i32, i32) {
    %c0_i32 = arith.constant 0 : i32
    %c0_i32_0 = arith.constant 0 : i32
    %c0_i32_1 = arith.constant 0 : i32
    return %c0_i32, %c0_i32_0 : i32, i32
  }
  func.func @transform_6(%arg0: i32) -> (i32, i32) {
    %c0_i32 = arith.constant 0 : i32
    %c0_i32_0 = arith.constant 0 : i32
    %c0_i32_1 = arith.constant 0 : i32
    return %c0_i32, %c0_i32_0 : i32, i32
  }
  func.func @transform_7(%arg0: i32) -> (i32, i32) {
    %c0_i32 = arith.constant 0 : i32
    %c0_i32_0 = arith.constant 0 : i32
    return %c0_i32, %arg0 : i32, i32
  }
  func.func @transform_8(%arg0: i32) -> (i32, i32) {
    %c0_i32 = arith.constant 0 : i32
    %c0_i32_0 = arith.constant 0 : i32
    return %arg0, %c0_i32 : i32, i32
  }
  func.func @transform_9(%arg0: i32) -> (i32, i32) {
    %c0_i32 = arith.constant 0 : i32
    %c0_i32_0 = arith.constant 0 : i32
    return %arg0, %c0_i32 : i32, i32
  }
  func.func @transform_10(%arg0: i32) -> (i32, i32) {
    %c0_i32 = arith.constant 0 : i32
    %c0_i32_0 = arith.constant 0 : i32
    return %arg0, %c0_i32 : i32, i32
  }
  func.func @transform_11(%arg0: i32) -> (i32, i32, i32) {
    %c0_i32 = arith.constant 0 : i32
    %c0_i32_0 = arith.constant 0 : i32
    %c0_i32_1 = arith.constant 0 : i32
    return %arg0, %c0_i32, %c0_i32_0 : i32, i32, i32
  }
}

</mosaic_0001>

<bundles_post_ra>
// kernel: tpu_custom_call.1
= control target key start
LH: loop header
LB: loop body
LE: loop exit
PB: predicated region body
PF: predicated region fallthrough
CT: control target
= control target key end

     0   :  { %17 = vsyncpa [#allocation3], 0  ;;  %s2470_s0 = inlined_call_operand.hbm [shape: bf16[8,1024], index: 0, kind: input, shape index: {}]   ;;  %s2471_s1 = inlined_call_operand.hbm [shape: bf16[1024,128], index: 1, kind: input, shape index: {}]   ;;  %s2472_s2 = inlined_call_operand.vmem [shape: f32[1,128], index: 2, kind: input, shape index: {}]   ;;  %s2473_s3 = inlined_call_operand.hbm [shape: bf16[128,640], index: 3, kind: input, shape index: {}]   ;;  %s2474_s4 = inlined_call_operand.vmem [shape: f32[1,640], index: 4, kind: input, shape index: {}]   ;;  %s2475_s5 = inlined_call_operand.hbm [shape: bf16[512,128], index: 5, kind: input, shape index: {}]   ;;  %s2476_s6 = inlined_call_operand.vmem [shape: f32[1,128], index: 6, kind: input, shape index: {}]   ;;  %s2477_s7 = inlined_call_operand.vmem [shape: bf16[2,8], index: 7, kind: input, shape index: {}]   ;;  %s2478_s8 = inlined_call_operand.hbm [shape: bf16[8,128], index: 8, kind: output, shape index: {0}]   ;;  %s2479_s9 = inlined_call_operand.hbm [shape: bf16[8,128], index: 9, kind: output, shape index: {1}]   ;;  %s2480_s10 = inlined_call_operand.hbm [shape: f32[8,128], index: 10, kind: output, shape index: {2}]   ;;  %s2481_s11 = inlined_call_operand.hbm [shape: f32[1,2,128], index: 11, kind: output, shape index: {3}]  }
   0x1   :  { %18 = vsyncpa [#allocation6], 0 }
   0x2   :  { %19 = vsyncpa [#allocation9], 0 }
   0x3   :  { %20 = vsyncpa [#allocation4], 0 }
   0x4   :  { %21 = vsyncpa [#allocation12], 0 }
   0x5   :  { %22 = vsyncpa [#allocation15], 0  ;;  %s2353_s17 = smov [#allocation5]  }
   0x6   :  { %s38_s18 = sshll.u32 %s2353_s17, 4  ;;  %s39_s18 = int_to_ptr.vmem [resolvable:$true] %s38_s18 }
   0x7   :  { %s2189_s19 = scalar_lea.vmem %s39_s18, 8192  ;;  %p2194_p1 = scmp.lt.s32.totalorder %s39_s18, %s39_s18 }
   0x8   :  { %p2190_p0 = scmp.ne.s32.totalorder %s39_s18, %s2189_s19  ;;  %p2195_p2 = scmp.lt.s32.totalorder %s2189_s19, %s2189_s19 }
   0xa   :  { %p2196_p3 = por %p2195_p2, %p2194_p1 }
   0xc   :  { %p2197_p4 = pnand %p2196_p3, %p2190_p0 }
   0xe   :  { %2200 = shalt.err (!%p2197_p4)
}
   0xf   :  { %s2354_s20 = smov 64   ;;  %s2355_s21 = smov 4  }
  0x10   :  { %44 = dma.hbm_to_vmem [thread:$0]  %s2471_s1, 8192, %s39_s18, [#allocation6], %s2354_s20, %s2354_s20, %s2355_s21  }
  0x11   :  { %s2356_s24 = smov [#allocation2]   ;;  %s2357_s26 = smov [#allocation7]  }
  0x12   :  { %s29_s25 = sshll.u32 %s2356_s24, 4  ;;  %s52_s27 = sshll.u32 %s2357_s26, 4  ;;  %s30_s25 = int_to_ptr.vmem [resolvable:$true] %s29_s25  ;;  %s53_s27 = int_to_ptr.vmem [resolvable:$true] %s52_s27 }
  0x13   :  { %s2209_s28 = scalar_lea.vmem %s30_s25, 512  ;;  %p2214_p6 = scmp.lt.s32.totalorder %s30_s25, %s30_s25 }
  0x14   :  { %p2210_p5 = scmp.ne.s32.totalorder %s30_s25, %s2209_s28  ;;  %p2215_p7 = scmp.lt.s32.totalorder %s2209_s28, %s2209_s28 }
  0x16   :  { %p2216_p8 = por %p2215_p7, %p2214_p6 }
  0x18   :  { %p2217_p9 = pnand %p2216_p8, %p2210_p5 }
  0x1a   :  { %2220 = shalt.err (!%p2217_p9)
}
  0x1b   :  { %32 = dma.hbm_to_vmem [thread:$0]  %s2470_s0, 512, %s30_s25, [#allocation3]  }
  0x1c   :  { %s2229_s12 = scalar_lea.vmem %s53_s27, 5120  ;;  %p2234_p11 = scmp.lt.s32.totalorder %s53_s27, %s53_s27 }
  0x1d   :  { %p2230_p10 = scmp.ne.s32.totalorder %s53_s27, %s2229_s12  ;;  %p2235_p12 = scmp.lt.s32.totalorder %s2229_s12, %s2229_s12 }
  0x1f   :  { %p2236_p13 = por %p2235_p12, %p2234_p11 }
  0x21   :  { %p2237_p0 = pnand %p2236_p13, %p2230_p10 }
  0x23   :  { %2240 = shalt.err (!%p2237_p0)
}
  0x24   :  { %s2358_s1 = smov 320   ;;  %s2359_s13 = smov 20  }
  0x25   :  { %58 = dma.hbm_to_vmem [thread:$0]  %s2473_s3, 5120, %s53_s27, [#allocation6], %s2358_s1, %s2358_s1, %s2359_s13  }
  0x26   :  { %s2360_s16 = smov [#allocation8]  }
  0x27   :  { %s66_s17 = sshll.u32 %s2360_s16, 4  ;;  %s67_s17 = int_to_ptr.vmem [resolvable:$true] %s66_s17 }
  0x28   :  { %s2249_s18 = scalar_lea.vmem %s67_s17, 4096  ;;  %p2254_p2 = scmp.lt.s32.totalorder %s67_s17, %s67_s17 }
  0x29   :  { %p2250_p1 = scmp.ne.s32.totalorder %s67_s17, %s2249_s18  ;;  %p2255_p3 = scmp.lt.s32.totalorder %s2249_s18, %s2249_s18 }
  0x2b   :  { %p2256_p4 = por %p2255_p3, %p2254_p2 }
  0x2d   :  { %p2257_p5 = pnand %p2256_p4, %p2250_p1 }
  0x2f   :  { %2260 = shalt.err (!%p2257_p5)
}
  0x30   :  { %72 = dma.hbm_to_vmem [thread:$0]  %s2475_s5, 4096, %s67_s17, [#allocation9], %s2354_s20, %s2354_s20, %s2355_s21  }
  0x31   :  { %2341 = dma.done.wait [#allocation3], 512  }
  0x32   :  { %2342 = vsyncadd [#allocation3], 4294966784 }
  0x33   :  { %2343 = dma.done.wait [#allocation6], 13312  }
  0x34   :  { %2344 = vsyncadd [#allocation6], 4294953984 }
  0x35   :  { %2345 = dma.done.wait [#allocation9], 4096  }
  0x36   :  { %2346 = vsyncadd [#allocation9], 4294963200  ;;  %v2015_v0 = vld [vmem:[#allocation5 + $0x78] sm:$0xff]   ;;  %v2019_v4 = vld [vmem:[#allocation5 + $0x70] sm:$0xff]   ;;  %vm2363_vm0 = vmmov 0   ;;  %vm1225_vm1 = vcmask 1043456  }
  0x37   :  { %v2016_v1 = vld [vmem:[#allocation5 + $0xf8] sm:$0xff]   ;;  %1831 = vmatprep.subr.bf16.mxu0 %v2015_v0  ;;  %v2020_v5 = vld [vmem:[#allocation5 + $0xf0] sm:$0xff]   ;;  %v2023_v8 = vld [vmem:[#allocation5 + $0x68] sm:$0xff]   ;;  %vm1221_vm2 = vcmask 64512   ;;  %s2364_s23 = smov [#allocation10]  }
  0x38   :  { %v2017_v2 = vld [vmem:[#allocation5 + $0x38] sm:$0xff]   ;;  %1853 = vmatprep.subr.bf16.mxu1 %v2016_v1  ;;  %v2021_v6 = vld [vmem:[#allocation5 + $0x30] sm:$0xff]   ;;  %v2024_v9 = vld [vmem:[#allocation5 + $0xe8] sm:$0xff]   ;;  %s1631_s24 = sshll.u32 %s2364_s23, 4  ;;  %s1632_s24 = int_to_ptr.vmem [resolvable:$true] %s1631_s24 }
  0x39   :  { %v2018_v3 = vld [vmem:[#allocation5 + $0xb8] sm:$0xff]   ;;  %1832 = vmatpush3.bf16.msra.mxu0 %v2017_v2  ;;  %v2022_v7 = vld [vmem:[#allocation5 + $0xb0] sm:$0xff]   ;;  %v2025_v10 = vld [vmem:[#allocation5 + $0x28] sm:$0xff]   ;;  %s2261_s25 = scalar_lea.vmem %s1632_s24, 64  ;;  %p2266_p7 = scmp.lt.s32.totalorder %s1632_s24, %s1632_s24 }
  0x3a   :  { %1854 = vmatpush3.bf16.msra.mxu1 %v2018_v3  ;;  %1833 = vmatprep.subr.bf16.mxu0 %v2019_v4  ;;  %v2026_v11 = vld [vmem:[#allocation5 + $0xa8] sm:$0xff]   ;;  %v2027_v12 = vld [vmem:[#allocation5 + $0x60] sm:$0xff]   ;;  %v2031_v16 = vld [vmem:[#allocation5 + $0x58] sm:$0xff]   ;;  %p2262_p6 = scmp.ne.s32.totalorder %s1632_s24, %s2261_s25  ;;  %p2267_p8 = scmp.lt.s32.totalorder %s2261_s25, %s2261_s25 }
  0x3b   :  { %1855 = vmatprep.subr.bf16.mxu1 %v2020_v5  ;;  %v2028_v13 = vld [vmem:[#allocation5 + $0xe0] sm:$0xff]   ;;  %v2032_v17 = vld [vmem:[#allocation5 + $0xd8] sm:$0xff]   ;;  %v2035_v20 = vld [vmem:[#allocation5 + $0x50] sm:$0xff]  }
  0x3c   :  { %v2029_v14 = vld [vmem:[#allocation5 + $0x20] sm:$0xff]   ;;  %v2033_v18 = vld [vmem:[#allocation5 + $0x18] sm:$0xff]   ;;  %v2036_v21 = vld [vmem:[#allocation5 + $0xd0] sm:$0xff]   ;;  %p2268_p9 = por %p2267_p8, %p2266_p7 }
  0x3d   :  { %1834 = vmatpush3.bf16.msra.mxu0 %v2021_v6  ;;  %v2030_v15 = vld [vmem:[#allocation5 + $0xa0] sm:$0xff]   ;;  %v2034_v19 = vld [vmem:[#allocation5 + $0x98] sm:$0xff]   ;;  %v2037_v22 = vld [vmem:[#allocation5 + $0x10] sm:$0xff]  }
  0x3e   :  { %1856 = vmatpush3.bf16.msra.mxu1 %v2022_v7  ;;  %1835 = vmatprep.subr.bf16.mxu0 %v2023_v8  ;;  %v2038_v23 = vld [vmem:[#allocation5 + $0x90] sm:$0xff]   ;;  %v2039_v24 = vld [vmem:[#allocation5 + $0x48] sm:$0xff]   ;;  %v2043_v28 = vld [vmem:[#allocation5 + $0x40] sm:$0xff]   ;;  %p2269_p10 = pnand %p2268_p9, %p2262_p6 }
  0x3f   :  { %1857 = vmatprep.subr.bf16.mxu1 %v2024_v9  ;;  %v2040_v25 = vld [vmem:[#allocation5 + $0xc8] sm:$0xff]   ;;  %v2044_v29 = vld [vmem:[#allocation5 + $0xc0] sm:$0xff]   ;;  %v2051_v38 = vld [vmem:[#allocation5 + $0x178] sm:$0xff]  }
  0x40   :  { %v2041_v26 = vld [vmem:[#allocation5 + $0x8] sm:$0xff]   ;;  %v2045_v30 = vld [vmem:[#allocation5] sm:$0xff]   ;;  %v2052_v39 = vld [vmem:[#allocation5 + $0x1f8] sm:$0xff]  }
  0x41   :  { %1836 = vmatpush3.bf16.msra.mxu0 %v2025_v10  ;;  %v2042_v27 = vld [vmem:[#allocation5 + $0x88] sm:$0xff]   ;;  %v2046_v31 = vld [vmem:[#allocation5 + $0x80] sm:$0xff]   ;;  %v2053_v40 = vld [vmem:[#allocation5 + $0x138] sm:$0xff]  }
  0x42   :  { %1858 = vmatpush3.bf16.msra.mxu1 %v2026_v11  ;;  %1837 = vmatprep.subr.bf16.mxu0 %v2027_v12  ;;  %v90_v32 = vld [vmem:[#allocation2] sm:$0xff]  ;;  %v91_v33 = vld [vmem:[#allocation2 + $0x8] sm:$0xff]  ;;  %v2054_v41 = vld [vmem:[#allocation5 + $0x1b8] sm:$0xff]  }
  0x43   :  { %1859 = vmatprep.subr.bf16.mxu1 %v2028_v13  ;;  %v1684_v34 = vcombine.low %v90_v32, %v90_v32  ;;  %v1685_v35 = vcombine.high %v90_v32, %v90_v32  ;;  %v1686_v36 = vcombine.low %v91_v33, %v91_v33  ;;  %v1687_v37 = vcombine.high %v91_v33, %v91_v33  ;;  %v2055_v42 = vld [vmem:[#allocation5 + $0x170] sm:$0xff]   ;;  %v2059_v46 = vld [vmem:[#allocation5 + $0x168] sm:$0xff]   ;;  %v2063_v50 = vld [vmem:[#allocation5 + $0x160] sm:$0xff]  }
  0x44   :  { %v2056_v43 = vld [vmem:[#allocation5 + $0x1f0] sm:$0xff]   ;;  %v2060_v47 = vld [vmem:[#allocation5 + $0x1e8] sm:$0xff]   ;;  %v2064_v51 = vld [vmem:[#allocation5 + $0x1e0] sm:$0xff]  }
  0x45   :  { %1838 = vmatpush3.bf16.msra.mxu0 %v2029_v14  ;;  %673 = vmatprep.mubr.bf16.mxu0 %v1685_v35  ;;  %v2057_v44 = vld [vmem:[#allocation5 + $0x130] sm:$0xff]   ;;  %v2061_v48 = vld [vmem:[#allocation5 + $0x128] sm:$0xff]   ;;  %v2065_v52 = vld [vmem:[#allocation5 + $0x120] sm:$0xff]  }
  0x46   :  { %1860 = vmatpush3.bf16.msra.mxu1 %v2030_v15  ;;  %1839 = vmatprep.subr.bf16.mxu0 %v2031_v16  ;;  %v2058_v45 = vld [vmem:[#allocation5 + $0x1b0] sm:$0xff]   ;;  %v2062_v49 = vld [vmem:[#allocation5 + $0x1a8] sm:$0xff]   ;;  %v2066_v53 = vld [vmem:[#allocation5 + $0x1a0] sm:$0xff]  }
  0x47   :  { %1861 = vmatprep.subr.bf16.mxu1 %v2032_v17  ;;  %713 = vmatprep.mubr.bf16.mxu1 %v1687_v37  ;;  %v2067_v54 = vld [vmem:[#allocation5 + $0x158] sm:$0xff]   ;;  %v2071_v58 = vld [vmem:[#allocation5 + $0x150] sm:$0xff]   ;;  %v2075_v62 = vld [vmem:[#allocation5 + $0x148] sm:$0xff]  }
  0x48   :  { %v2068_v55 = vld [vmem:[#allocation5 + $0x1d8] sm:$0xff]   ;;  %v2072_v59 = vld [vmem:[#allocation5 + $0x1d0] sm:$0xff]   ;;  %v2076_v63 = vld [vmem:[#allocation5 + $0x1c8] sm:$0xff]  }
  0x49   :  { %1840 = vmatpush3.bf16.msra.mxu0 %v2033_v18  ;;  %v2069_v56 = vld [vmem:[#allocation5 + $0x118] sm:$0xff]   ;;  %v2073_v60 = vld [vmem:[#allocation5 + $0x110] sm:$0xff]   ;;  %v2077_v0 = vld [vmem:[#allocation5 + $0x108] sm:$0xff]  }
  0x4a   :  { %1862 = vmatpush3.bf16.msra.mxu1 %v2034_v19  ;;  %1841 = vmatprep.subr.bf16.mxu0 %v2035_v20  ;;  %v2070_v57 = vld [vmem:[#allocation5 + $0x198] sm:$0xff]   ;;  %v2074_v61 = vld [vmem:[#allocation5 + $0x190] sm:$0xff]   ;;  %v2078_v1 = vld [vmem:[#allocation5 + $0x188] sm:$0xff]  }
  0x4b   :  { %1863 = vmatprep.subr.bf16.mxu1 %v2036_v21  ;;  %v2079_v2 = vld [vmem:[#allocation5 + $0x140] sm:$0xff]   ;;  %v92_v6 = vld [vmem:[#allocation2 + $0x10] sm:$0xff]  ;;  %v93_v9 = vld [vmem:[#allocation2 + $0x18] sm:$0xff] }
  0x4c   :  { %v2080_v3 = vld [vmem:[#allocation5 + $0x1c0] sm:$0xff]   ;;  %v1688_v7 = vcombine.low %v92_v6, %v92_v6  ;;  %v1689_v8 = vcombine.high %v92_v6, %v92_v6  ;;  %v1690_v10 = vcombine.low %v93_v9, %v93_v9  ;;  %v1691_v11 = vcombine.high %v93_v9, %v93_v9  ;;  %v2087_v12 = vld [vmem:[#allocation7 + $0x118] ss:$20 sps:$4 sm:$0xff]   ;;  %v2089_v13 = vld [vmem:[#allocation7 + $0x11c] ss:$20 sps:$4 sm:$0xff]  }
  0x4d   :  { %1842 = vmatpush3.bf16.msra.mxu0 %v2037_v22  ;;  %v2081_v4 = vld [vmem:[#allocation5 + $0x100] sm:$0xff]   ;;  %v2095_v16 = vld [vmem:[#allocation7 + $0xf4] ss:$20 sps:$4 sm:$0xff]   ;;  %v2098_v17 = vld [vmem:[#allocation7 + $0xfc] ss:$20 sps:$4 sm:$0xff]  }
  0x4e   :  { %1864 = vmatpush3.bf16.msra.mxu1 %v2038_v23  ;;  %1843 = vmatprep.subr.bf16.mxu0 %v2039_v24  ;;  %v2082_v5 = vld [vmem:[#allocation5 + $0x180] sm:$0xff]   ;;  %v2096_v19 = vld [vmem:[#allocation7 + $0xf8] ss:$20 sps:$4 sm:$0xff]   ;;  %v2104_v21 = vld [vmem:[#allocation7 + $0xd4] ss:$20 sps:$4 sm:$0xff]  }
  0x4f   :  { %1865 = vmatprep.subr.bf16.mxu1 %v2040_v25  ;;  %v2090_v14 = vld [vmem:[#allocation7 + $0x120] ss:$20 sps:$4 sm:$0xff]   ;;  %v2092_v15 = vld [vmem:[#allocation7 + $0x124] ss:$20 sps:$4 sm:$0xff]   ;;  %v2099_v22 = vld [vmem:[#allocation7 + $0xc8] ss:$20 sps:$4 sm:$0xff]  }
  0x50   :  { %v2093_v18 = vld [vmem:[#allocation7 + $0xf0] ss:$20 sps:$4 sm:$0xff]   ;;  %v2101_v20 = vld [vmem:[#allocation7 + $0xcc] ss:$20 sps:$4 sm:$0xff]   ;;  %v2119_v32 = vld [vmem:[#allocation7 + $0x54] ss:$20 sps:$4 sm:$0xff]  }
  0x51   :  { %1844 = vmatpush3.bf16.msra.mxu0 %v2041_v26  ;;  %v2102_v23 = vld [vmem:[#allocation7 + $0xd0] ss:$20 sps:$4 sm:$0xff]   ;;  %v2110_v25 = vld [vmem:[#allocation7 + $0xac] ss:$20 sps:$4 sm:$0xff]   ;;  %v2123_v37 = vld [vmem:[#allocation7 + $0x28] ss:$20 sps:$4 sm:$0xff]  }
  0x52   :  { %1866 = vmatpush3.bf16.msra.mxu1 %v2042_v27  ;;  %1845 = vmatprep.subr.bf16.mxu0 %v2043_v28  ;;  %v2107_v24 = vld [vmem:[#allocation7 + $0xa4] ss:$20 sps:$4 sm:$0xff]   ;;  %v2105_v26 = vld [vmem:[#allocation7 + $0xa0] ss:$20 sps:$4 sm:$0xff]   ;;  %v2108_v27 = vld [vmem:[#allocation7 + $0xa8] ss:$20 sps:$4 sm:$0xff]  }
  0x53   :  { %1867 = vmatprep.subr.bf16.mxu1 %v2044_v29  ;;  %v2113_v28 = vld [vmem:[#allocation7 + $0x7c] ss:$20 sps:$4 sm:$0xff]   ;;  %v2116_v29 = vld [vmem:[#allocation7 + $0x84] ss:$20 sps:$4 sm:$0xff]   ;;  %v2136_v9 = vld [vmem:[#allocation7 + $0x100] ss:$20 sps:$4 sm:$0xff]  }
  0x54   :  { %v2122_v33 = vld [vmem:[#allocation7 + $0x5c] ss:$20 sps:$4 sm:$0xff]   ;;  %v2120_v35 = vld [vmem:[#allocation7 + $0x58] ss:$20 sps:$4 sm:$0xff]  }
  0x55   :  { %1846 = vmatpush3.bf16.msra.mxu0 %v2045_v30  ;;  %v2111_v30 = vld [vmem:[#allocation7 + $0x78] ss:$20 sps:$4 sm:$0xff]  }
  0x56   :  { %1868 = vmatpush3.bf16.msra.mxu1 %v2046_v31  ;;  %1875 = vmatprep.subr.bf16.mxu0 %v2051_v38  ;;  %v2114_v31 = vld [vmem:[#allocation7 + $0x80] ss:$20 sps:$4 sm:$0xff]  }
  0x57   :  { %1897 = vmatprep.subr.bf16.mxu1 %v2052_v39  ;;  %v2128_v38 = vld [vmem:[#allocation7 + $0x34] ss:$20 sps:$4 sm:$0xff]   ;;  %v2126_v39 = vld [vmem:[#allocation7 + $0x30] ss:$20 sps:$4 sm:$0xff]  }
  0x58   :  { %674 = vmatmul.mubr.bf16.vlgmr.msra.gmra.mxu0 %v1684_v34  ;;  %v2117_v34 = vld [vmem:[#allocation7 + $0x50] ss:$20 sps:$4 sm:$0xff]  }
  0x59   :  { %714 = vmatmul.mubr.bf16.vlgmr.msra.gmra.mxu1 %v1686_v36  ;;  %1876 = vmatpush3.bf16.msra.mxu0 %v2053_v40  ;;  %v2125_v36 = vld [vmem:[#allocation7 + $0x2c] ss:$20 sps:$4 sm:$0xff]   ;;  %v2131_v40 = vld [vmem:[#allocation7 + $0x4] ss:$20 sps:$4 sm:$0xff]  }
  0x5a   :  { %1898 = vmatpush3.bf16.msra.mxu1 %v2054_v41  ;;  %1877 = vmatprep.subr.bf16.mxu0 %v2055_v42  ;;  %v2129_v41 = vld [vmem:[#allocation7] ss:$20 sps:$4 sm:$0xff]  }
  0x5b   :  { %1899 = vmatprep.subr.bf16.mxu1 %v2056_v43  ;;  %753 = vmatprep.mubr.bf16.mxu0 %v1689_v8  ;;  %v2134_v42 = vld [vmem:[#allocation7 + $0xc] ss:$20 sps:$4 sm:$0xff]   ;;  %v2132_v43 = vld [vmem:[#allocation7 + $0x8] ss:$20 sps:$4 sm:$0xff]  }
  0x5c   :  { %793 = vmatprep.mubr.bf16.mxu1 %v1691_v11  ;;  %v2138_v11 = vld [vmem:[#allocation7 + $0xb0] ss:$20 sps:$4 sm:$0xff]  }
  0x5d   :  { %1878 = vmatpush3.bf16.msra.mxu0 %v2057_v44  ;;  %v2361_v44 = vmov 0  }
  0x5e   :  { %1900 = vmatpush3.bf16.msra.mxu1 %v2058_v45  ;;  %1879 = vmatprep.subr.bf16.mxu0 %v2059_v46  ;;  %v2362_v45 = vmov 0.0  }
  0x5f   :  { %1901 = vmatprep.subr.bf16.mxu1 %v2060_v47 }
  0x61   :  { %1880 = vmatpush3.bf16.msra.mxu0 %v2061_v48 }
  0x62   :  { %1902 = vmatpush3.bf16.msra.mxu1 %v2062_v49  ;;  %1881 = vmatprep.subr.bf16.mxu0 %v2063_v50 }
  0x63   :  { %1903 = vmatprep.subr.bf16.mxu1 %v2064_v51 }
  0x65   :  { %1882 = vmatpush3.bf16.msra.mxu0 %v2065_v52 }
  0x66   :  { %1904 = vmatpush3.bf16.msra.mxu1 %v2066_v53  ;;  %1883 = vmatprep.subr.bf16.mxu0 %v2067_v54 }
  0x67   :  { %1905 = vmatprep.subr.bf16.mxu1 %v2068_v55  ;;  %v1683_v55 = vld [vmem:[%s2472_s2] ss:$0 sm:$0xff] }
  0x69   :  { %1884 = vmatpush3.bf16.msra.mxu0 %v2069_v56 }
  0x6a   :  { %1906 = vmatpush3.bf16.msra.mxu1 %v2070_v57  ;;  %1885 = vmatprep.subr.bf16.mxu0 %v2071_v58 }
  0x6b   :  { %1907 = vmatprep.subr.bf16.mxu1 %v2072_v59 }
  0x6d   :  { %1886 = vmatpush3.bf16.msra.mxu0 %v2073_v60 }
  0x6e   :  { %1908 = vmatpush3.bf16.msra.mxu1 %v2074_v61  ;;  %1887 = vmatprep.subr.bf16.mxu0 %v2075_v62 }
  0x6f   :  { %1909 = vmatprep.subr.bf16.mxu1 %v2076_v63 }
  0x71   :  { %1888 = vmatpush3.bf16.msra.mxu0 %v2077_v0 }
  0x72   :  { %1910 = vmatpush3.bf16.msra.mxu1 %v2078_v1  ;;  %1889 = vmatprep.subr.bf16.mxu0 %v2079_v2 }
  0x73   :  { %1911 = vmatprep.subr.bf16.mxu1 %v2080_v3 }
  0x75   :  { %1890 = vmatpush3.bf16.msra.mxu0 %v2081_v4 }
  0x76   :  { %1912 = vmatpush3.bf16.msra.mxu1 %v2082_v5  ;;  %1086 = vmatprep.subr.bf16.mxu0 %v2089_v13  ;;  %v2140_v13 = vld [vmem:[#allocation7 + $0x60] ss:$20 sps:$4 sm:$0xff]  }
  0x77   :  { %1127 = vmatprep.subr.bf16.mxu1 %v2092_v15  ;;  %v2142_v15 = vld [vmem:[#allocation7 + $0x10] ss:$20 sps:$4 sm:$0xff]  }
  0x78   :  { %754 = vmatmul.mubr.bf16.vlgmr.msra.gmra.mxu0 %v1688_v7  ;;  %v2135_v7 = vld [vmem:[#allocation7 + $0x128] ss:$20 sps:$4 sm:$0xff]  }
  0x79   :  { %794 = vmatmul.mubr.bf16.vlgmr.msra.gmra.mxu1 %v1690_v10  ;;  %1087 = vmatpush1.bf16.msra.mxu0 %v2087_v12  ;;  %v2137_v10 = vld [vmem:[#allocation7 + $0xd8] ss:$20 sps:$4 sm:$0xff]   ;;  %v2139_v12 = vld [vmem:[#allocation7 + $0x88] ss:$20 sps:$4 sm:$0xff]  }
  0x7a   :  { %1128 = vmatpush1.bf16.msra.mxu1 %v2090_v14  ;;  %1088 = vmatprep.subr.bf16.mxu0 %v2095_v16  ;;  %v2141_v14 = vld [vmem:[#allocation7 + $0x38] ss:$20 sps:$4 sm:$0xff]  }
  0x7b   :  { %1129 = vmatprep.subr.bf16.mxu1 %v2098_v17  ;;  %1118 = vmatprep.mubr.bf16.mxu0 %v2361_v44  ;;  %v2143_v16 = vld [vmem:[#allocation8 + $0xf8] sm:$0xff]  }
  0x7c   :  { %1159 = vmatprep.mubr.bf16.mxu1 %v2361_v44  ;;  %v2144_v17 = vld [vmem:[#allocation8 + $0xb8] sm:$0xff]  }
  0x7d   :  { %1089 = vmatpush1.bf16.msra.mxu0 %v2093_v18  ;;  %v2147_v18 = vld [vmem:[#allocation8 + $0xf0] sm:$0xff]  }
  0x7e   :  { %1130 = vmatpush1.bf16.msra.mxu1 %v2096_v19  ;;  %1090 = vmatprep.subr.bf16.mxu0 %v2101_v20  ;;  %v2148_v19 = vld [vmem:[#allocation8 + $0xb0] sm:$0xff]   ;;  %v2151_v20 = vld [vmem:[#allocation8 + $0xe8] sm:$0xff]  }
  0x7f   :  { %1131 = vmatprep.subr.bf16.mxu1 %v2104_v21  ;;  %v2152_v21 = vld [vmem:[#allocation8 + $0xa8] sm:$0xff]  }
  0x81   :  { %1091 = vmatpush1.bf16.msra.mxu0 %v2099_v22  ;;  %v2155_v22 = vld [vmem:[#allocation8 + $0xe0] sm:$0xff]  }
  0x82   :  { %1132 = vmatpush1.bf16.msra.mxu1 %v2102_v23  ;;  %1092 = vmatprep.subr.bf16.mxu0 %v2107_v24  ;;  %v2156_v23 = vld [vmem:[#allocation8 + $0xa0] sm:$0xff]   ;;  %v2159_v24 = vld [vmem:[#allocation8 + $0xd8] sm:$0xff]  }
  0x83   :  { %1133 = vmatprep.subr.bf16.mxu1 %v2110_v25  ;;  %v2160_v25 = vld [vmem:[#allocation8 + $0x98] sm:$0xff]  }
  0x85   :  { %1093 = vmatpush1.bf16.msra.mxu0 %v2105_v26  ;;  %v2163_v26 = vld [vmem:[#allocation8 + $0xd0] sm:$0xff]  }
  0x86   :  { %1134 = vmatpush1.bf16.msra.mxu1 %v2108_v27  ;;  %1094 = vmatprep.subr.bf16.mxu0 %v2113_v28  ;;  %v2164_v27 = vld [vmem:[#allocation8 + $0x90] sm:$0xff]   ;;  %v2167_v28 = vld [vmem:[#allocation8 + $0xc8] sm:$0xff]  }
  0x87   :  { %1135 = vmatprep.subr.bf16.mxu1 %v2116_v29  ;;  %v2168_v29 = vld [vmem:[#allocation8 + $0x88] sm:$0xff]  }
  0x89   :  { %1095 = vmatpush1.bf16.msra.mxu0 %v2111_v30  ;;  %v2171_v30 = vld [vmem:[#allocation8 + $0xc0] sm:$0xff]  }
  0x8a   :  { %1136 = vmatpush1.bf16.msra.mxu1 %v2114_v31  ;;  %1096 = vmatprep.subr.bf16.mxu0 %v2119_v32  ;;  %v2172_v31 = vld [vmem:[#allocation8 + $0x80] sm:$0xff]   ;;  %v853_v32 = vlaneseq }
  0x8b   :  { %1137 = vmatprep.subr.bf16.mxu1 %v2122_v33 }
  0x8c   :  { %v854_v33 = vshrl.u32 %v853_v32, 7 }
  0x8d   :  { %1097 = vmatpush1.bf16.msra.mxu0 %v2117_v34 }
  0x8e   :  { %1138 = vmatpush1.bf16.msra.mxu1 %v2120_v35  ;;  %1098 = vmatprep.subr.bf16.mxu0 %v2125_v36  ;;  %v855_v34 = vsub.s32 0, %v854_v33  ;;  %v863_v35 = vsub.s32 2, %v854_v33  ;;  %v851_v36 = vld [vmem:[%s2474_s4] sm:$0x1f] }
  0x8f   :  { %1139 = vmatprep.subr.bf16.mxu1 %v2128_v38 }
  0x90   :  { %v864_v38 = vrot.slane %v851_v36, %v863_v35 }
  0x91   :  { %1099 = vmatpush1.bf16.msra.mxu0 %v2123_v37  ;;  %v856_v37 = vrot.slane %v851_v36, %v855_v34 }
  0x92   :  { %1140 = vmatpush1.bf16.msra.mxu1 %v2126_v39  ;;  %1100 = vmatprep.subr.bf16.mxu0 %v2131_v40 }
  0x93   :  { %1141 = vmatprep.subr.bf16.mxu1 %v2134_v42 }
  0x95   :  { %1101 = vmatpush1.bf16.msra.mxu0 %v2129_v41 }
  0x96   :  { %1142 = vmatpush1.bf16.msra.mxu1 %v2132_v43  ;;  %1974 = vmatprep.subr.bf16.mxu0 %v2362_v45 }
  0x97   :  { %1994 = vmatprep.subr.bf16.mxu1 %v2362_v45 }
 0x118   :  { %v1847_v46 = vpop.f32.mrf.mxu0 }
 0x119   :  { %v1869_v47 = vpop.f32.mrf.mxu1 }
 0x11a   :  { %v1848_v48 = vpop.f32.mrf.mxu0 }
 0x11b   :  { %v1870_v49 = vpop.f32.mrf.mxu1  ;;  %v1849_v54 = vadd.f32 %v1848_v48, %v1847_v46 }
 0x11c   :  { %v1850_v50 = vpop.f32.mrf.mxu0  ;;  %v1871_v57 = vadd.f32 %v1870_v49, %v1869_v47  ;;  %v2145_v47 = vld [vmem:[#allocation8 + $0x78] sm:$0xff]  }
 0x11d   :  { %v1872_v51 = vpop.f32.mrf.mxu1  ;;  %v676_v56 = vadd.f32 %v1849_v54, %v1683_v55  ;;  %v1219_v54 = vld [vmem:[%s2477_s7] sm:$0x1]  ;;  %v2146_v55 = vld [vmem:[#allocation8 + $0x38] sm:$0xff]  }
 0x11e   :  { %v1851_v52 = vpop.f32.mrf.mxu0 }
 0x11f   :  { %v1873_v53 = vpop.f32.mrf.mxu1  ;;  %v716_v62 = vadd.f32 %v1871_v57, %v676_v56  ;;  %v2149_v56 = vld [vmem:[#allocation8 + $0x70] sm:$0xff]  }
 0x138   :  { %v1891_v58 = vpop.f32.mrf.mxu0 }
 0x139   :  { %v1913_v59 = vpop.f32.mrf.mxu1 }
 0x13a   :  { %v1892_v60 = vpop.f32.mrf.mxu0 }
 0x13b   :  { %v1914_v61 = vpop.f32.mrf.mxu1  ;;  %v1893_v63 = vadd.f32 %v1892_v60, %v1891_v58  ;;  %v2150_v58 = vld [vmem:[#allocation8 + $0x30] sm:$0xff]   ;;  %v2154_v60 = vld [vmem:[#allocation8 + $0x28] sm:$0xff]  }
 0x13c   :  { %v1894_v0 = vpop.f32.mrf.mxu0  ;;  %v1915_v3 = vadd.f32 %v1914_v61, %v1913_v59  ;;  %v2153_v59 = vld [vmem:[#allocation8 + $0x68] sm:$0xff]   ;;  %v2157_v61 = vld [vmem:[#allocation8 + $0x60] sm:$0xff]  }
 0x13d   :  { %v1916_v1 = vpop.f32.mrf.mxu1  ;;  %v756_v2 = vadd.f32 %v1893_v63, %v716_v62  ;;  %v2158_v63 = vld [vmem:[#allocation8 + $0x20] sm:$0xff]  }
 0x13e   :  { %v1895_v4 = vpop.f32.mrf.mxu0  ;;  %v2161_v1 = vld [vmem:[#allocation8 + $0x58] sm:$0xff]  }
 0x13f   :  { %v1917_v5 = vpop.f32.mrf.mxu1  ;;  %v796_v6 = vadd.f32 %v1915_v3, %v756_v2  ;;  %v867_v2 = vsub.s32 3, %v854_v33  ;;  %v2162_v3 = vld [vmem:[#allocation8 + $0x18] sm:$0xff]   ;;  %v859_v4 = vsub.s32 1, %v854_v33 }
 0x140   :  { %v2165_v5 = vld [vmem:[#allocation8 + $0x50] sm:$0xff]  }
 0x141   :  { %v801_v8 = vpack.c.bf16 %v796_v6, %v796_v6  ;;  %v871_v6 = vsub.s32 4, %v854_v33 }
 0x143   :  { %802 = vst [vmem:[#allocation10] sm:$0xf] %v801_v8  ;;  %1119 = vmatmul.mubr.bf16.vlgmr.msra.gmra.mxu0 %v801_v8  ;;  %1160 = vmatmul.mubr.bf16.vlgmr.msra.gmra.mxu1 %v801_v8 }
 0x144   :  { %1975 = vmatpush3.bf16.msra.mxu0 %v2135_v7  ;;  %1990 = vmatprep.mubr.msk.bf16.mxu0 %vm2363_vm0, %v2362_v45  ;;  %v868_v7 = vrot.slane %v851_v36, %v867_v2 }
 0x145   :  { %1976 = vmatprep.subr.bf16.mxu0 %v2362_v45  ;;  %1996 = vmatprep.mubr.msk.bf16.mxu1 %vm2363_vm0, %v2362_v45 }
 0x148   :  { %1977 = vmatpush3.bf16.msra.mxu0 %v2136_v9  ;;  %v860_v9 = vrot.slane %v851_v36, %v859_v4 }
 0x149   :  { %1978 = vmatprep.subr.bf16.mxu0 %v2362_v45 }
 0x14c   :  { %1979 = vmatpush3.bf16.msra.mxu0 %v2137_v10  ;;  %v2169_v10 = vld [vmem:[#allocation8 + $0x48] sm:$0xff]  }
 0x14d   :  { %1980 = vmatprep.subr.bf16.mxu0 %v2362_v45 }
 0x150   :  { %1981 = vmatpush3.bf16.msra.mxu0 %v2138_v11  ;;  %v872_v11 = vrot.slane %v851_v36, %v871_v6  ;;  %v1798_v36 = vld [vmem:[%s2476_s6] ss:$0 sm:$0xff] }
 0x151   :  { %1982 = vmatprep.subr.bf16.mxu0 %v2362_v45 }
 0x154   :  { %1983 = vmatpush3.bf16.msra.mxu0 %v2139_v12 }
 0x155   :  { %1984 = vmatprep.subr.bf16.mxu0 %v2362_v45 }
 0x158   :  { %1985 = vmatpush3.bf16.msra.mxu0 %v2140_v13  ;;  %v2170_v13 = vld [vmem:[#allocation8 + $0x8] sm:$0xff]  }
 0x159   :  { %1986 = vmatprep.subr.bf16.mxu0 %v2362_v45 }
 0x15c   :  { %1987 = vmatpush3.bf16.msra.mxu0 %v2141_v14 }
 0x15d   :  { %1988 = vmatprep.subr.bf16.mxu0 %v2362_v45 }
 0x160   :  { %1989 = vmatpush3.bf16.msra.mxu0 %v2142_v15  ;;  %v2173_v15 = vld [vmem:[#allocation8 + $0x40] sm:$0xff]  }
 0x161   :  { %1952 = vmatprep.subr.bf16.mxu0 %v2143_v16 }
 0x163   :  { %1991 = vmatmul.mubr.bf16.vlgmr.msra.gmra.mxu0 %v801_v8  ;;  %v2166_v8 = vld [vmem:[#allocation8 + $0x10] sm:$0xff]  }
 0x164   :  { %1953 = vmatpush3.bf16.msra.mxu0 %v2144_v17 }
 0x165   :  { %1954 = vmatprep.subr.bf16.mxu0 %v2147_v18 }
 0x168   :  { %1955 = vmatpush3.bf16.msra.mxu0 %v2148_v19 }
 0x169   :  { %1956 = vmatprep.subr.bf16.mxu0 %v2151_v20 }
 0x16c   :  { %1957 = vmatpush3.bf16.msra.mxu0 %v2152_v21  ;;  %v2174_v21 = vld [vmem:[#allocation8] sm:$0xff]  }
 0x16d   :  { %1958 = vmatprep.subr.bf16.mxu0 %v2155_v22 }
 0x170   :  { %1959 = vmatpush3.bf16.msra.mxu0 %v2156_v23 }
 0x171   :  { %1960 = vmatprep.subr.bf16.mxu0 %v2159_v24 }
 0x174   :  { %1961 = vmatpush3.bf16.msra.mxu0 %v2160_v25 }
 0x175   :  { %1962 = vmatprep.subr.bf16.mxu0 %v2163_v26 }
 0x178   :  { %1963 = vmatpush3.bf16.msra.mxu0 %v2164_v27 }
 0x179   :  { %1964 = vmatprep.subr.bf16.mxu0 %v2167_v28 }
 0x17c   :  { %1965 = vmatpush3.bf16.msra.mxu0 %v2168_v29 }
 0x17d   :  { %1966 = vmatprep.subr.bf16.mxu0 %v2171_v30 }
 0x180   :  { %1967 = vmatpush3.bf16.msra.mxu0 %v2172_v31 }
 0x203   :  { %v1120_v39 = vpop.f32.mrf.mxu0  ;;  %v1161_v40 = vpop.f32.mrf.mxu1 }
 0x204   :  { %v1121_v41 = vadd.f32 %v1120_v39, %v856_v37  ;;  %v1162_v42 = vadd.f32 %v1161_v40, %v864_v38 }
 0x205   :  { %v1122_v43 = vpop.f32.mrf.mxu0  ;;  %v1163_v44 = vpop.f32.mrf.mxu1 }
 0x206   :  { %v1796_v45 = vmul.f32 -1.442695, %v1121_v41  ;;  %v1220_v46 = vpack.c.bf16 %v1121_v41, %v1121_v41  ;;  %v1209_v48 = vmax.f32 %v1162_v42, 0.0  ;;  %v1164_v12 = vadd.f32 %v1163_v44, %v868_v7 }
 0x207   :  { %v1124_v49 = vpop.f32.mrf.mxu0  ;;  %v1165_v50 = vpop.f32.mrf.mxu1  ;;  %v1123_v14 = vadd.f32 %v1122_v43, %v860_v9 }
 0x208   :  { %2175 = vpow2.f32 %v1796_v45  ;;  %v1227_v51 = vsel %vm1225_vm1, %v1220_v46, 0  ;;  %v1271_v57 = vpack.c.bf16 %v1209_v48, %v1209_v48  ;;  %v1210_v19 = vmax.f32 %v1164_v12, 0.0 }
 0x209   :  { %v1125_v52 = vpop.f32.mrf.mxu0  ;;  %v1166_v53 = vpop.f32.mrf.mxu1  ;;  %1995 = vmatpush3.bf16.msra.mxu1 %v1227_v51  ;;  %v1208_v22 = vmax.f32 %v1123_v14, 0.0 }
 0x20a   :  { %1930 = vmatprep.subr.bf16.mxu1 %v2145_v47  ;;  %v1272_v26 = vpack.c.bf16 %v1210_v19, %v1210_v19 }
 0x20b   :  { %v1270_v28 = vpack.c.bf16 %v1208_v22, %v1208_v22 }
 0x20c   :  { %1997 = vmatmul.mubr.msk.bf16.vlgmr.msra.gmra.mxu1 %vm1221_vm2, %v1219_v54 }
 0x20d   :  { %1931 = vmatpush3.bf16.msra.mxu1 %v2146_v55  ;;  %1569 = vmatprep.mubr.bf16.mxu1 %v1271_v57 }
 0x20e   :  { %1932 = vmatprep.subr.bf16.mxu1 %v2149_v56 }
 0x211   :  { %1933 = vmatpush3.bf16.msra.mxu1 %v2150_v58 }
 0x212   :  { %1934 = vmatprep.subr.bf16.mxu1 %v2153_v59 }
 0x215   :  { %v2176_v62 = vpop.eup %2175  ;;  %1935 = vmatpush3.bf16.msra.mxu1 %v2154_v60 }
 0x216   :  { %v1215_v0 = vadd.f32 1.0, %v2176_v62  ;;  %1936 = vmatprep.subr.bf16.mxu1 %v2157_v61 }
 0x218   :  { %2177 = vrcp.f32 %v1215_v0 }
 0x219   :  { %1937 = vmatpush3.bf16.msra.mxu1 %v2158_v63 }
 0x21a   :  { %1938 = vmatprep.subr.bf16.mxu1 %v2161_v1 }
 0x21d   :  { %1939 = vmatpush3.bf16.msra.mxu1 %v2162_v3 }
 0x21e   :  { %1940 = vmatprep.subr.bf16.mxu1 %v2165_v5 }
 0x221   :  { %1941 = vmatpush3.bf16.msra.mxu1 %v2166_v8 }
 0x222   :  { %1942 = vmatprep.subr.bf16.mxu1 %v2169_v10 }
 0x223   :  { %v1202_v16 = vpop.f32.mrf.mxu0 }
 0x224   :  { %v1203_v17 = vadd.f32 %v1202_v16, %v872_v11 }
 0x225   :  { %v2178_v18 = vpop.eup %2177  ;;  %v1992_v20 = vpop.f32.mrf.mxu0  ;;  %1943 = vmatpush3.bf16.msra.mxu1 %v2170_v13 }
 0x226   :  { %1218 = vst [vmem:[#allocation13] sm:$0xff] %v2178_v18  ;;  %v1211_v23 = vmax.f32 %v1203_v17, 0.0  ;;  %1944 = vmatprep.subr.bf16.mxu1 %v2173_v15 }
 0x227   :  { %v1205_v24 = vpop.f32.mrf.mxu0 }
 0x228   :  { %v1273_v25 = vpack.c.bf16 %v1211_v23, %v1211_v23 }
 0x229   :  { %v1993_v27 = vpop.f32.mrf.mxu0  ;;  %1945 = vmatpush3.bf16.msra.mxu1 %v2174_v21 }
 0x22a   :  { %1609 = vmatprep.mubr.bf16.mxu0 %v1273_v25 }
 0x22b   :  { %1610 = vmatmul.mubr.bf16.vlgmr.msra.gmra.mxu0 %v1272_v26 }
 0x22c   :  { %1570 = vmatmul.mubr.bf16.vlgmr.msra.gmra.mxu1 %v1270_v28 }
 0x2cc   :  { %v1263_v29 = vpop.f32.mrf.mxu1 }
 0x2cd   :  { %1269 = vst [vmem:[#allocation14] sm:$0x3] %v1263_v29 }
 0x2ce   :  { %v1998_v30 = vpop.f32.mrf.mxu1 }
 0x2d0   :  { %v1266_v31 = vpop.f32.mrf.mxu1 }
 0x2d2   :  { %v1999_v32 = vpop.f32.mrf.mxu1 }
 0x2eb   :  { %v1968_v33 = vpop.f32.mrf.mxu0 }
 0x2ec   :  { %v1946_v34 = vpop.f32.mrf.mxu1 }
 0x2ed   :  { %v1969_v35 = vpop.f32.mrf.mxu0 }
 0x2ee   :  { %v1947_v37 = vpop.f32.mrf.mxu1  ;;  %v1970_v41 = vadd.f32 %v1969_v35, %v1968_v33 }
 0x2ef   :  { %v1948_v38 = vadd.f32 %v1947_v37, %v1946_v34  ;;  %v1971_v39 = vpop.f32.mrf.mxu0 }
 0x2f0   :  { %v1949_v40 = vpop.f32.mrf.mxu1 }
 0x2f1   :  { %v1572_v42 = vadd.f32 %v1948_v38, %v1798_v36  ;;  %v1972_v43 = vpop.f32.mrf.mxu0 }
 0x2f2   :  { %v1950_v44 = vpop.f32.mrf.mxu1 }
 0x2f3   :  { %v1612_v45 = vadd.f32 %v1970_v41, %v1572_v42 }
 0x2f5   :  { %v1617_v46 = vmul.f32 %v1612_v45, %v1612_v45 }
 0x2f7   :  { %1618 = vadd.xlane.f32.xlu0 %v1617_v46 }
 0x2f8   :  { %2272 = shalt.err (!%p2269_p10)
}
 0x2f9   :  { %1634 = dma.vmem_to_hbm [thread:$0]  %s1632_s24, 64, %s2478_s8, [#allocation4]  }
 0x2fa   :  { %s2365_s27 = smov [#allocation14]  }
 0x2fb   :  { %s1661_s28 = sshll.u32 %s2365_s27, 4  ;;  %s1662_s28 = int_to_ptr.vmem [resolvable:$true] %s1661_s28 }
 0x2fc   :  { %s2281_s29 = scalar_lea.vmem %s1662_s28, 32  ;;  %p2286_p12 = scmp.lt.s32.totalorder %s1662_s28, %s1662_s28 }
 0x2fd   :  { %p2282_p11 = scmp.ne.s32.totalorder %s1662_s28, %s2281_s29  ;;  %p2287_p13 = scmp.lt.s32.totalorder %s2281_s29, %s2281_s29 }
 0x2ff   :  { %p2288_p0 = por %p2287_p13, %p2286_p12 }
 0x301   :  { %p2289_p1 = pnand %p2288_p0, %p2282_p11 }
 0x303   :  { %2292 = shalt.err (!%p2289_p1)
}
 0x304   :  { %1664 = dma.vmem_to_hbm [thread:$0]  %s1662_s28, 32, %s2481_s11, [#allocation15]  }
 0x305   :  { %s2366_s1 = smov [#allocation11]   ;;  %s2367_s13 = smov [#allocation13]  }
 0x306   :  { %s1641_s8 = sshll.u32 %s2366_s1, 4  ;;  %s1651_s14 = sshll.u32 %s2367_s13, 4  ;;  %s1642_s8 = int_to_ptr.vmem [resolvable:$true] %s1641_s8  ;;  %s1652_s14 = int_to_ptr.vmem [resolvable:$true] %s1651_s14 }
 0x307   :  { %s2301_s15 = scalar_lea.vmem %s1642_s8, 64  ;;  %p2306_p3 = scmp.lt.s32.totalorder %s1642_s8, %s1642_s8 }
 0x308   :  { %p2302_p2 = scmp.ne.s32.totalorder %s1642_s8, %s2301_s15  ;;  %p2307_p4 = scmp.lt.s32.totalorder %s2301_s15, %s2301_s15 }
 0x30a   :  { %p2308_p5 = por %p2307_p4, %p2306_p3 }
 0x30c   :  { %p2309_p6 = pnand %p2308_p5, %p2302_p2 }
 0x380   :  { %v1619_v47 = vpop.xlane.xlu0 %1618 }
 0x381   :  { %v1620_v48 = vadd.f32 1e-24, %v1619_v47 }
 0x383   :  { %2179 = vrsqrt.f32 %v1620_v48 }
 0x390   :  { %v2180_v49 = vpop.eup %2179 }
 0x391   :  { %v1622_v50 = vmul.f32 %v2180_v49, %v1612_v45 }
 0x393   :  { %v1623_v51 = vpack.c.bf16 %v1622_v50, %v1622_v50 }
 0x395   :  { %1624 = vst [vmem:[#allocation11] sm:$0xf] %v1623_v51 }
 0x396   :  { %2312 = shalt.err (!%p2309_p6)
}
 0x397   :  { %1644 = dma.vmem_to_hbm [thread:$0]  %s1642_s8, 64, %s2479_s9, [#allocation12]  }
 0x398   :  { %s2321_s17 = scalar_lea.vmem %s1652_s14, 128  ;;  %p2326_p8 = scmp.lt.s32.totalorder %s1652_s14, %s1652_s14 }
 0x399   :  { %p2322_p7 = scmp.ne.s32.totalorder %s1652_s14, %s2321_s17  ;;  %p2327_p9 = scmp.lt.s32.totalorder %s2321_s17, %s2321_s17 }
 0x39b   :  { %p2328_p10 = por %p2327_p9, %p2326_p8 }
 0x39d   :  { %p2329_p11 = pnand %p2328_p10, %p2322_p7 }
 0x39f   :  { %2332 = shalt.err (!%p2329_p11)
}
 0x3a0   :  { %1654 = dma.vmem_to_hbm [thread:$0]  %s1652_s14, 128, %s2480_s10, [#allocation12]  }
 0x3a1   :  { %2347 = dma.done.wait [#allocation4], 64  }
 0x3a2   :  { %2348 = vsyncadd [#allocation4], 4294967232 }
 0x3a3   :  { %2349 = dma.done.wait [#allocation12], 192  }
 0x3a4   :  { %2350 = vsyncadd [#allocation12], 4294967104 }
 0x3a5   :  { %2351 = dma.done.wait [#allocation15], 32  }
 0x3a6   :  { %2352 = vsyncadd [#allocation15], 4294967264 }
 0x3a7   :  { %1677 = vsyncpa [#allocation3], 1 }
 0x3a8   :  { %1678 = vsyncpa [#allocation6], 1 }
 0x3a9   :  { %1679 = vsyncpa [#allocation9], 1 }
 0x3aa   :  { %1680 = vsyncpa [#allocation4], 1 }
 0x3ab   :  { %1681 = vsyncpa [#allocation12], 1 }
 0x3ac   :  { %1682 = vsyncpa [#allocation15], 1 }

</bundles_post_ra>
